<compile_context>
chip_gen: v6e
topology: v6e:2x2x1
jax: 0.10.0
libtpu: 0.0.40
codegen_flags: <defaults>
</compile_context>

<pallas_src>
import functools

import jax
import jax.numpy as jnp
from jax import lax
from jax.experimental import pallas as pl
from jax.experimental.pallas import tpu as pltpu


def _hicl_loss_kernel(skills_ref, labels_ref, es_ref, ejt_ref, loss_ref, *,
                      batch, inv_temp, eps):
    # skills_ref : VMEM (TB, S) int32   -- skill ids of this batch tile
    # labels_ref : VMEM (TB, 1) int32   -- job label per user of this tile
    # es_ref     : VMEM (V, D)          -- skill embedding table (resident)
    # ejt_ref    : VMEM (D, J)          -- pre-transposed job table (resident)
    # loss_ref   : VMEM (TB, 128) f32   -- per-user loss, lane-broadcast
    i = pl.program_id(0)
    tile_b, S = skills_ref.shape
    V, D = es_ref.shape
    J = ejt_ref.shape[1]
    scale = jnp.float32(inv_temp) / jnp.float32(S)   # fold 1/S and 1/temperature

    # --- count matrix C[u, v] = #{s : skills[u, s] == v}  (VPU compares) --------
    skills = skills_ref[...]                                   # (TB, S) int32
    col_v = lax.broadcasted_iota(jnp.int32, (tile_b, V), 1)
    counts = jnp.zeros((tile_b, V), jnp.float32)
    for s in range(S):                                         # static, small S
        counts = counts + (col_v == skills[:, s:s + 1]).astype(jnp.float32)

    # --- pooled user embeddings on the MXU: (TB, V) @ (V, D) --------------------
    pooled = jnp.dot(counts * scale, es_ref[...],
                     preferred_element_type=jnp.float32)       # (TB, D) f32

    # --- logits = pooled @ E_j^T  (E_j already transposed in the wrapper) -------
    logits = jnp.dot(pooled, ejt_ref[...],
                     preferred_element_type=jnp.float32)       # (TB, J) f32

    # --- per-user loss: -log(softmax(logits)[label] + eps), via logsumexp -------
    m = jnp.max(logits, axis=-1, keepdims=True)                # (TB, 1)
    lse = m + jnp.log(jnp.sum(jnp.exp(logits - m), axis=-1, keepdims=True))

    labels = labels_ref[...]                                   # (TB, 1) int32
    col_j = lax.broadcasted_iota(jnp.int32, (tile_b, J), 1)
    picked = jnp.sum(jnp.where(col_j == labels, logits, 0.0),
                     axis=-1, keepdims=True)                   # (TB, 1)

    p_label = jnp.exp(picked - lse)                            # softmax at label
    per_user = -jnp.log(p_label + eps)                         # (TB, 1)

    # mask padded users
    row = lax.broadcasted_iota(jnp.int32, (tile_b, 1), 0)
    valid = (i * tile_b + row) < batch
    per_user = jnp.where(valid, per_user, 0.0)

    # lane-dense, (8,128)-aligned output block
    loss_ref[...] = jnp.broadcast_to(per_user, (tile_b, 128))


def top_hicl_matching_loss(E_j, E_s, user_jobs, user_skills, *, tile_b=256):
    """Training-mode forward of Top_HiCL_Matching (metric='avg').

    E_j         : (J, D) job embedding table
    E_s         : (V, D) skill embedding table
    user_jobs   : (B,)    int job ids (labels)
    user_skills : (B, S)  int skill ids per user (all users have S skills)
    Returns scalar mean loss (float32).
    """
    B, S = user_skills.shape
    J, D = E_j.shape
    V = E_s.shape[0]

    # Batch tiling: multiple of 8 sublanes, no larger than the padded batch.
    b_pad8 = ((B + 7) // 8) * 8
    tile_b = max(8, min(((int(tile_b) + 7) // 8) * 8, b_pad8))
    num_tiles = (b_pad8 + tile_b - 1) // tile_b
    # v7x megacore: prefer >= 2 tiles so ("parallel",) uses both TensorCores.
    if num_tiles == 1 and tile_b >= 16:
        tile_b = ((tile_b // 2 + 7) // 8) * 8
        num_tiles = (b_pad8 + tile_b - 1) // tile_b
    B_pad = num_tiles * tile_b

    # Only int32 ids cross HBM per user (no (B,S,D) gather, no (B,J) one-hot).
    skills = jnp.zeros((B_pad, S), jnp.int32)
    skills = skills.at[:B].set(user_skills.astype(jnp.int32))
    labels = jnp.zeros((B_pad, 1), jnp.int32)
    labels = labels.at[:B, 0].set(user_jobs.astype(jnp.int32))

    # One transpose in XLA, outside the grid; keeps the in-kernel matmul straight.
    E_jT = jnp.transpose(E_j)                                  # (D, J)

    kernel = functools.partial(_hicl_loss_kernel,
                               batch=B, inv_temp=10.0, eps=1e-9)

    grid_spec = pltpu.PrefetchScalarGridSpec(
        num_scalar_prefetch=0,
        grid=(num_tiles,),
        in_specs=[
            pl.BlockSpec((tile_b, S), lambda i: (i, 0)),       # skill ids (VMEM)
            pl.BlockSpec((tile_b, 1), lambda i: (i, 0)),       # labels
            # Resident tables: constant block index => DMA'd once.
            # TODO(synk): single-buffer these (pl.Buffered(1)) / stream them when
            #             (V+J)*D*itemsize approaches the per-core VMEM budget.
            pl.BlockSpec((V, D), lambda i: (0, 0)),            # E_s resident
            pl.BlockSpec((D, J), lambda i: (0, 0)),            # E_j^T resident
        ],
        out_specs=pl.BlockSpec((tile_b, 128), lambda i: (i, 0)),
    )

    # VMEM budget: tables (x2 default double-buffering) + per-step blocks +
    # in-kernel intermediates, clamped to device capacity (v7x = 64 MiB/TC).
    itemsize = jnp.dtype(E_j.dtype).itemsize
    resident = 2 * (V * D + D * J) * itemsize
    per_step = 2 * (tile_b * S * 4 + tile_b * 4 + tile_b * 128 * 4)
    working = tile_b * (V + J + D) * 4
    needed = resident + per_step + working + (4 << 20)
    try:
        vmem_cap = int(pltpu.get_tpu_info().vmem_capacity_bytes)
    except Exception:
        vmem_cap = 64 * 1024 * 1024
    vmem_limit = int(min(max(needed, 16 * 1024 * 1024), vmem_cap))

    per_user = pl.pallas_call(
        kernel,
        out_shape=jax.ShapeDtypeStruct((B_pad, 128), jnp.float32),
        grid_spec=grid_spec,
        compiler_params=pltpu.CompilerParams(
            dimension_semantics=("parallel",),     # shard batch tiles over TCs
            vmem_limit_bytes=vmem_limit,
        ),
    )(skills, labels, E_s, E_jT)

    # TODO(synk): test=True branch (top-k retrieval / metric list bookkeeping) is
    #             host-side Python, not a kernel hot path, and is omitted.
    return jnp.sum(per_user[:, 0]) / B


if __name__ == "__main__":
    key = jax.random.PRNGKey(0)
    k_ej, k_es, k_jobs, k_skills = jax.random.split(key, 4)

    # Small deterministic synthetic setup.
    num_jobs = 16         # J
    num_skill_vocab = 20  # skill vocab size V
    hidden = 32           # D (embedding dim)
    batch = 4             # B users
    skills_per_user = 8   # S

    E_j = jax.random.normal(k_ej, (num_jobs, hidden), dtype=jnp.float32)
    E_s = jax.random.normal(k_es, (num_skill_vocab, hidden), dtype=jnp.float32)

    user_jobs = jax.random.randint(k_jobs, (batch,), 0, num_jobs, dtype=jnp.int32)
    user_skills = jax.random.randint(
        k_skills, (batch, skills_per_user), 0, num_skill_vocab, dtype=jnp.int32)

    loss = top_hicl_matching_loss(E_j, E_s, user_jobs, user_skills)
    jax.block_until_ready(loss)

    # Pure-JAX reference of the original PyTorch math.
    pooled_ref = jnp.mean(E_s[user_skills], axis=1)
    logits_ref = (pooled_ref @ E_j.T) / 0.1
    probs_ref = jax.nn.softmax(logits_ref, axis=-1)
    oh = jax.nn.one_hot(user_jobs, num_jobs, dtype=jnp.float32)
    loss_ref = jnp.mean(-jnp.sum(oh * jnp.log(probs_ref + 1e-9), axis=-1))
    assert jnp.allclose(loss, loss_ref, rtol=1e-4, atol=1e-4), (loss, loss_ref)

    print("KERNEL_OK")
</pallas_src>

<mosaic_0001>
module attributes {stable_mosaic.version = 11 : i64} {
  func.func @_hicl_loss_kernel(%arg0: i32, %arg1: memref<8x8xi32, #tpu.memory_space<vmem>>, %arg2: memref<8x1xi32, #tpu.memory_space<vmem>>, %arg3: memref<20x32xf32, #tpu.memory_space<vmem>>, %arg4: memref<32x16xf32, #tpu.memory_space<vmem>>, %arg5: memref<8x128xf32, #tpu.memory_space<vmem>>) attributes {dimension_semantics = [#tpu.dimension_semantics<parallel>], iteration_bounds = array<i64: 1>, scalar_prefetch = 0 : i64, scratch_operands = 0 : i64, tpu.core_type = #tpu.core_type<tc>, window_params = [{transform_indices = @transform_0, window_bounds = array<i64: 8, 8>}, {transform_indices = @transform_1, window_bounds = array<i64: 8, 1>}, {pipeline_mode = #tpu.pipeline_mode<synchronous>, transform_indices = @transform_2, window_bounds = array<i64: 20, 32>}, {pipeline_mode = #tpu.pipeline_mode<synchronous>, transform_indices = @transform_3, window_bounds = array<i64: 32, 16>}, {transform_indices = @transform_4, window_bounds = array<i64: 8, 128>}]} {
    %cst = arith.constant 1.000000e+01 : f32
    %cst_0 = arith.constant 8.000000e+00 : f32
    %0 = arith.divf %cst, %cst_0 : f32
    %c0 = arith.constant 0 : index
    %c0_1 = arith.constant 0 : index
    %1 = vector.load %arg1[%c0, %c0_1] : memref<8x8xi32, #tpu.memory_space<vmem>>, vector<8x8xi32>
    %2 = tpu.iota {dimensions = array<i32: 1>} : vector<8x20xi32>
    %cst_2 = arith.constant 0.000000e+00 : f32
    %3 = vector.broadcast %cst_2 : f32 to vector<8x20xf32>
    %4 = vector.extract_strided_slice %1 {offsets = [0, 0], sizes = [8, 1], strides = [1, 1]} : vector<8x8xi32> to vector<8x1xi32>
    %5 = vector.broadcast %4 : vector<8x1xi32> to vector<8x20xi32>
    %6 = arith.cmpi eq, %2, %5 : vector<8x20xi32>
    %7 = arith.extui %6 : vector<8x20xi1> to vector<8x20xi32>
    %8 = arith.sitofp %7 : vector<8x20xi32> to vector<8x20xf32>
    %9 = arith.addf %3, %8 : vector<8x20xf32>
    %10 = vector.extract_strided_slice %1 {offsets = [0, 1], sizes = [8, 1], strides = [1, 1]} : vector<8x8xi32> to vector<8x1xi32>
    %11 = vector.broadcast %10 : vector<8x1xi32> to vector<8x20xi32>
    %12 = arith.cmpi eq, %2, %11 : vector<8x20xi32>
    %13 = arith.extui %12 : vector<8x20xi1> to vector<8x20xi32>
    %14 = arith.sitofp %13 : vector<8x20xi32> to vector<8x20xf32>
    %15 = arith.addf %9, %14 : vector<8x20xf32>
    %16 = vector.extract_strided_slice %1 {offsets = [0, 2], sizes = [8, 1], strides = [1, 1]} : vector<8x8xi32> to vector<8x1xi32>
    %17 = vector.broadcast %16 : vector<8x1xi32> to vector<8x20xi32>
    %18 = arith.cmpi eq, %2, %17 : vector<8x20xi32>
    %19 = arith.extui %18 : vector<8x20xi1> to vector<8x20xi32>
    %20 = arith.sitofp %19 : vector<8x20xi32> to vector<8x20xf32>
    %21 = arith.addf %15, %20 : vector<8x20xf32>
    %22 = vector.extract_strided_slice %1 {offsets = [0, 3], sizes = [8, 1], strides = [1, 1]} : vector<8x8xi32> to vector<8x1xi32>
    %23 = vector.broadcast %22 : vector<8x1xi32> to vector<8x20xi32>
    %24 = arith.cmpi eq, %2, %23 : vector<8x20xi32>
    %25 = arith.extui %24 : vector<8x20xi1> to vector<8x20xi32>
    %26 = arith.sitofp %25 : vector<8x20xi32> to vector<8x20xf32>
    %27 = arith.addf %21, %26 : vector<8x20xf32>
    %28 = vector.extract_strided_slice %1 {offsets = [0, 4], sizes = [8, 1], strides = [1, 1]} : vector<8x8xi32> to vector<8x1xi32>
    %29 = vector.broadcast %28 : vector<8x1xi32> to vector<8x20xi32>
    %30 = arith.cmpi eq, %2, %29 : vector<8x20xi32>
    %31 = arith.extui %30 : vector<8x20xi1> to vector<8x20xi32>
    %32 = arith.sitofp %31 : vector<8x20xi32> to vector<8x20xf32>
    %33 = arith.addf %27, %32 : vector<8x20xf32>
    %34 = vector.extract_strided_slice %1 {offsets = [0, 5], sizes = [8, 1], strides = [1, 1]} : vector<8x8xi32> to vector<8x1xi32>
    %35 = vector.broadcast %34 : vector<8x1xi32> to vector<8x20xi32>
    %36 = arith.cmpi eq, %2, %35 : vector<8x20xi32>
    %37 = arith.extui %36 : vector<8x20xi1> to vector<8x20xi32>
    %38 = arith.sitofp %37 : vector<8x20xi32> to vector<8x20xf32>
    %39 = arith.addf %33, %38 : vector<8x20xf32>
    %40 = vector.extract_strided_slice %1 {offsets = [0, 6], sizes = [8, 1], strides = [1, 1]} : vector<8x8xi32> to vector<8x1xi32>
    %41 = vector.broadcast %40 : vector<8x1xi32> to vector<8x20xi32>
    %42 = arith.cmpi eq, %2, %41 : vector<8x20xi32>
    %43 = arith.extui %42 : vector<8x20xi1> to vector<8x20xi32>
    %44 = arith.sitofp %43 : vector<8x20xi32> to vector<8x20xf32>
    %45 = arith.addf %39, %44 : vector<8x20xf32>
    %46 = vector.extract_strided_slice %1 {offsets = [0, 7], sizes = [8, 1], strides = [1, 1]} : vector<8x8xi32> to vector<8x1xi32>
    %47 = vector.broadcast %46 : vector<8x1xi32> to vector<8x20xi32>
    %48 = arith.cmpi eq, %2, %47 : vector<8x20xi32>
    %49 = arith.extui %48 : vector<8x20xi1> to vector<8x20xi32>
    %50 = arith.sitofp %49 : vector<8x20xi32> to vector<8x20xf32>
    %51 = arith.addf %45, %50 : vector<8x20xf32>
    %52 = vector.broadcast %0 : f32 to vector<8x20xf32>
    %53 = arith.mulf %51, %52 : vector<8x20xf32>
    %c0_3 = arith.constant 0 : index
    %c0_4 = arith.constant 0 : index
    %54 = vector.load %arg3[%c0_3, %c0_4] : memref<20x32xf32, #tpu.memory_space<vmem>>, vector<20x32xf32>
    %cst_5 = arith.constant dense<0.000000e+00> : vector<8x32xf32>
    %55 = tpu.matmul %53, %54, %cst_5 {dimension_numbers = #tpu.dot_dimension_numbers<[1], [0], [0], [1], [0, 0, 1, 1], [], []>} : vector<8x20xf32>, vector<20x32xf32>, vector<8x32xf32> -> vector<8x32xf32>
    %c0_6 = arith.constant 0 : index
    %c0_7 = arith.constant 0 : index
    %56 = vector.load %arg4[%c0_6, %c0_7] : memref<32x16xf32, #tpu.memory_space<vmem>>, vector<32x16xf32>
    %cst_8 = arith.constant dense<0.000000e+00> : vector<8x16xf32>
    %57 = tpu.matmul %55, %56, %cst_8 {dimension_numbers = #tpu.dot_dimension_numbers<[1], [0], [0], [1], [0, 0, 1, 1], [], []>} : vector<8x32xf32>, vector<32x16xf32>, vector<8x16xf32> -> vector<8x16xf32>
    %cst_9 = arith.constant dense<0xFF800000> : vector<8xf32>
    %58 = vector.multi_reduction <maximumf>, %57, %cst_9 [1] : vector<8x16xf32> to vector<8xf32>
    %59 = vector.shape_cast %58 : vector<8xf32> to vector<8x1xf32>
    %60 = vector.broadcast %59 : vector<8x1xf32> to vector<8x16xf32>
    %61 = arith.subf %57, %60 : vector<8x16xf32>
    %62 = math.exp %61 : vector<8x16xf32>
    %cst_10 = arith.constant dense<0.000000e+00> : vector<8xf32>
    %63 = vector.multi_reduction <add>, %62, %cst_10 [1] : vector<8x16xf32> to vector<8xf32>
    %64 = vector.shape_cast %63 : vector<8xf32> to vector<8x1xf32>
    %65 = math.log %64 : vector<8x1xf32>
    %66 = arith.addf %59, %65 : vector<8x1xf32>
    %c0_11 = arith.constant 0 : index
    %c0_12 = arith.constant 0 : index
    %67 = vector.load %arg2[%c0_11, %c0_12] : memref<8x1xi32, #tpu.memory_space<vmem>>, vector<8x1xi32>
    %68 = tpu.iota {dimensions = array<i32: 1>} : vector<8x16xi32>
    %69 = vector.broadcast %67 : vector<8x1xi32> to vector<8x16xi32>
    %70 = arith.cmpi eq, %68, %69 : vector<8x16xi32>
    %cst_13 = arith.constant 0.000000e+00 : f32
    %71 = vector.broadcast %cst_13 : f32 to vector<8x16xf32>
    %72 = arith.select %70, %57, %71 : vector<8x16xi1>, vector<8x16xf32>
    %cst_14 = arith.constant dense<0.000000e+00> : vector<8xf32>
    %73 = vector.multi_reduction <add>, %72, %cst_14 [1] : vector<8x16xf32> to vector<8xf32>
    %74 = vector.shape_cast %73 : vector<8xf32> to vector<8x1xf32>
    %75 = arith.subf %74, %66 : vector<8x1xf32>
    %76 = math.exp %75 : vector<8x1xf32>
    %cst_15 = arith.constant 9.99999971E-10 : f32
    %77 = vector.broadcast %cst_15 : f32 to vector<8x1xf32>
    %78 = arith.addf %76, %77 : vector<8x1xf32>
    %79 = math.log %78 : vector<8x1xf32>
    %cst_16 = arith.constant 0.000000e+00 : f32
    %80 = vector.broadcast %cst_16 : f32 to vector<8x1xf32>
    %81 = arith.subf %80, %79 : vector<8x1xf32>
    %82 = tpu.iota {dimensions = array<i32: 0>} : vector<8x1xi32>
    %c8_i32 = arith.constant 8 : i32
    %83 = arith.muli %arg0, %c8_i32 : i32
    %84 = vector.broadcast %83 : i32 to vector<8x1xi32>
    %85 = arith.addi %84, %82 : vector<8x1xi32>
    %c4_i32 = arith.constant 4 : i32
    %86 = vector.broadcast %c4_i32 : i32 to vector<8x1xi32>
    %87 = arith.cmpi slt, %85, %86 : vector<8x1xi32>
    %cst_17 = arith.constant 0.000000e+00 : f32
    %88 = vector.broadcast %cst_17 : f32 to vector<8x1xf32>
    %89 = arith.select %87, %81, %88 : vector<8x1xi1>, vector<8x1xf32>
    %90 = vector.shape_cast %89 : vector<8x1xf32> to vector<8x1xf32>
    %91 = vector.broadcast %90 : vector<8x1xf32> to vector<8x128xf32>
    %c0_18 = arith.constant 0 : index
    %c0_19 = arith.constant 0 : index
    %92 = vector.load %arg5[%c0_18, %c0_19] : memref<8x128xf32, #tpu.memory_space<vmem>>, vector<8x128xf32>
    tpu.vector_store %arg5[%c0_18, %c0_19], %91 {strides = array<i32>} : memref<8x128xf32, #tpu.memory_space<vmem>>, vector<8x128xf32>,
    return
  }
  func.func @transform_0(%arg0: i32) -> (i32, i32) {
    %c0_i32 = arith.constant 0 : i32
    %c0_i32_0 = arith.constant 0 : i32
    return %arg0, %c0_i32 : i32, i32
  }
  func.func @transform_1(%arg0: i32) -> (i32, i32) {
    %c0_i32 = arith.constant 0 : i32
    %c0_i32_0 = arith.constant 0 : i32
    return %arg0, %c0_i32 : i32, i32
  }
  func.func @transform_2(%arg0: i32) -> (i32, i32) {
    %c0_i32 = arith.constant 0 : i32
    %c0_i32_0 = arith.constant 0 : i32
    %c0_i32_1 = arith.constant 0 : i32
    return %c0_i32, %c0_i32_0 : i32, i32
  }
  func.func @transform_3(%arg0: i32) -> (i32, i32) {
    %c0_i32 = arith.constant 0 : i32
    %c0_i32_0 = arith.constant 0 : i32
    %c0_i32_1 = arith.constant 0 : i32
    return %c0_i32, %c0_i32_0 : i32, i32
  }
  func.func @transform_4(%arg0: i32) -> (i32, i32) {
    %c0_i32 = arith.constant 0 : i32
    %c0_i32_0 = arith.constant 0 : i32
    return %arg0, %c0_i32 : i32, i32
  }
}

</mosaic_0001>

<bundles_post_ra>
// kernel: tpu_custom_call.1
= control target key start
LH: loop header
LB: loop body
LE: loop exit
PB: predicated region body
PF: predicated region fallthrough
CT: control target
= control target key end

     0   :  { %v379_v1 = vmov 2   ;;  %v380_v2 = vmov 0   ;;  %s464_s0 = inlined_call_operand.vmem [shape: s32[8,8], index: 0, kind: input, shape index: {}]   ;;  %s465_s1 = inlined_call_operand.vmem [shape: s32[8,1], index: 1, kind: input, shape index: {}]   ;;  %s466_s2 = inlined_call_operand.vmem [shape: f32[20,32], index: 2, kind: input, shape index: {}]   ;;  %s467_s3 = inlined_call_operand.vmem [shape: f32[32,16], index: 3, kind: input, shape index: {}]   ;;  %s468_s4 = inlined_call_operand.hbm [shape: f32[8,128], index: 4, kind: output, shape index: {}]  }
   0x1   :  { %v18_v0 = vld [vmem:[%s464_s0] sm:$0xff]  ;;  %341 = vset.pattern.permute.xlu1 %v379_v1  ;;  %339 = vset.pattern.permute.xlu0 %v380_v2 }
   0x2   :  { %9 = vsyncpa [#allocation3], 0  ;;  %36 = vperm.xlu1 %341, %v18_v0   ;;  %22 = vperm.xlu0 %339, %v18_v0   ;;  %v381_v3 = vmov 0.0   ;;  %v382_v4 = vmov 3   ;;  %v383_v5 = vmov 1   ;;  %v384_v6 = vmov 4  }
   0x3   :  { %308 = vmatprep.subr.mxu0 %v381_v3  ;;  %317 = vmatprep.subr.mxu1 %v381_v3  ;;  %v385_v7 = vmov 5   ;;  %v386_v8 = vmov 6   ;;  %v80_v9 = vld [vmem:[%s466_s2 + $0x10] sm:$0xf]  ;;  %vm85_vm0 = vcmask 1043456   ;;  %v79_v10 = vld [vmem:[%s466_s2 + $0x8] sm:$0xff]  ;;  %v19_v16 = vlaneseq }
   0x4   :  { %309 = vmatpush3.msk.msra.mxu0 %vm85_vm0, %v80_v9  ;;  %v387_v11 = vmov 7   ;;  %v78_v12 = vld [vmem:[%s466_s2] sm:$0xff]  ;;  %vm388_vm1 = vmmov 0   ;;  %v162_v13 = vld [vmem:[%s467_s3 + $0x18] sm:$0xff]  ;;  %v161_v14 = vld [vmem:[%s467_s3 + $0x10] sm:$0xff]  ;;  %vm81_vm10 = vcmask 162816  }
   0x5   :  { %310 = vmatprep.subr.mxu0 %v381_v3  ;;  %314 = vmatprep.mubr.msk.f32.mxu0 %vm388_vm1, %v381_v3  ;;  %v160_v15 = vld [vmem:[%s467_s3 + $0x8] sm:$0xff]  ;;  %v20_v19 = vand.u32 127, %v19_v16  ;;  %v159_v42 = vld [vmem:[%s467_s3] sm:$0xff]  ;;  %vm163_vm11 = vcmask 261120   ;;  %vm237_vm12 = vcmask 130048  }
   0x6   :  { %342 = vset.pattern.permute.xlu1 %v382_v4  ;;  %340 = vset.pattern.permute.xlu0 %v383_v5  ;;  %v250_v43 = vld [vmem:[%s465_s1] sm:$0xff]  ;;  %s389_s1 = smov [#allocation2]  }
   0x7   :  { %43 = vperm.xlu1 %342, %v18_v0   ;;  %29 = vperm.xlu0 %340, %v18_v0   ;;  %s280_s3 = sshll.u32 %s389_s1, 4  ;;  %s281_s3 = int_to_ptr.vmem [resolvable:$true] %s280_s3 }
   0x8   :  { %311 = vmatpush3.msra.mxu0 %v79_v10  ;;  %325 = vmatprep.mubr.msk.f32.mxu1 %vm388_vm1, %v381_v3  ;;  %s357_s5 = scalar_lea.vmem %s281_s3, 128  ;;  %p362_p1 = scmp.lt.s32.totalorder %s281_s3, %s281_s3 }
   0x9   :  { %312 = vmatprep.subr.mxu0 %v381_v3  ;;  %318 = vmatpush3.msra.mxu1 %v162_v13  ;;  %p358_p0 = scmp.ne.s32.totalorder %s281_s3, %s357_s5  ;;  %p363_p2 = scmp.lt.s32.totalorder %s357_s5, %s357_s5 }
   0xa   :  { %313 = vmatpush3.msra.mxu0 %v78_v12  ;;  %319 = vmatprep.subr.mxu1 %v381_v3 }
   0xb   :  { %343 = vset.pattern.permute.xlu1 %v384_v6  ;;  %344 = vset.pattern.permute.xlu0 %v385_v7  ;;  %p364_p3 = por %p363_p2, %p362_p1 }
   0xc   :  { %50 = vperm.xlu1 %343, %v18_v0   ;;  %57 = vperm.xlu0 %344, %v18_v0  }
   0xd   :  { %320 = vmatpush3.msra.mxu1 %v161_v14  ;;  %p365_p4 = pnand %p364_p3, %p358_p0 }
   0xe   :  { %321 = vmatprep.subr.mxu1 %v381_v3 }
   0xf   :  { %322 = vmatpush3.msra.mxu1 %v160_v15 }
  0x10   :  { %345 = vset.pattern.permute.xlu1 %v386_v8  ;;  %348 = vset.pattern.permute.xlu0 %v380_v2 }
  0x11   :  { %64 = vperm.xlu1 %345, %v18_v0   ;;  %323 = vmatprep.subr.mxu1 %v381_v3 }
  0x12   :  { %324 = vmatpush3.msra.mxu1 %v159_v42 }
  0x15   :  { %346 = vset.pattern.permute.xlu1 %v387_v11 }
  0x16   :  { %71 = vperm.xlu1 %346, %v18_v0  }
  0x1a   :  { %347 = vset.pattern.permute.xlu1 %v380_v2  ;;  %v267_v2 = vshrl.u32 %v19_v16, 7 }
  0x1b   :  { %252 = vperm.xlu1 %347, %v250_v43  }
  0x1c   :  { %vm271_vm14 = vcmp.lt.s32.totalorder %v267_v2, 4 }
  0x7d   :  { %v37_v17 = vpop.permute.xlu1 %36  ;;  %v23_v18 = vpop.permute.xlu0 %22 }
  0x7e   :  { %vm24_vm2 = vcmp.eq.s32.totalorder %v20_v19, %v23_v18  ;;  %vm38_vm3 = vcmp.eq.s32.totalorder %v20_v19, %v37_v17 }
  0x7f   :  { %v288_v22 = vsel %vm24_vm2, 1.0, %v381_v3  ;;  %v290_v25 = vsel %vm38_vm3, 1.0, %v381_v3 }
  0x82   :  { %v44_v20 = vpop.permute.xlu1 %43  ;;  %v30_v21 = vpop.permute.xlu0 %29 }
  0x83   :  { %vm31_vm4 = vcmp.eq.s32.totalorder %v20_v19, %v30_v21  ;;  %vm45_vm5 = vcmp.eq.s32.totalorder %v20_v19, %v44_v20 }
  0x84   :  { %v289_v23 = vsel %vm31_vm4, 1.0, %v381_v3  ;;  %v291_v29 = vsel %vm45_vm5, 1.0, %v381_v3 }
  0x85   :  { %v34_v24 = vadd.f32 %v289_v23, %v288_v22 }
  0x87   :  { %v41_v26 = vadd.f32 %v290_v25, %v34_v24  ;;  %v51_v27 = vpop.permute.xlu1 %50  ;;  %v58_v28 = vpop.permute.xlu0 %57 }
  0x88   :  { %vm52_vm6 = vcmp.eq.s32.totalorder %v20_v19, %v51_v27  ;;  %vm59_vm7 = vcmp.eq.s32.totalorder %v20_v19, %v58_v28 }
  0x89   :  { %v48_v30 = vadd.f32 %v291_v29, %v41_v26  ;;  %v292_v31 = vsel %vm52_vm6, 1.0, %v381_v3  ;;  %v293_v33 = vsel %vm59_vm7, 1.0, %v381_v3 }
  0x8b   :  { %v55_v32 = vadd.f32 %v292_v31, %v48_v30 }
  0x8c   :  { %v65_v34 = vpop.permute.xlu1 %64 }
  0x8d   :  { %vm66_vm8 = vcmp.eq.s32.totalorder %v20_v19, %v65_v34  ;;  %v62_v35 = vadd.f32 %v293_v33, %v55_v32 }
  0x8e   :  { %v294_v36 = vsel %vm66_vm8, 1.0, %v381_v3 }
  0x8f   :  { %v69_v38 = vadd.f32 %v294_v36, %v62_v35 }
  0x91   :  { %v72_v37 = vpop.permute.xlu1 %71 }
  0x92   :  { %vm73_vm9 = vcmp.eq.s32.totalorder %v20_v19, %v72_v37 }
  0x93   :  { %v295_v39 = vsel %vm73_vm9, 1.0, %v381_v3 }
  0x94   :  { %v76_v40 = vadd.f32 %v295_v39, %v69_v38 }
  0x96   :  { %v77_v41 = vmul.f32 1.25, %v76_v40  ;;  %v253_v46 = vpop.permute.xlu1 %252 }
  0x97   :  { %vm254_vm13 = vcmp.eq.s32.totalorder %v20_v19, %v253_v46 }
  0x98   :  { %315 = vmatmul.mubr.msk.f32.vlgmr.msra.gmra.mxu0 %vm81_vm10, %v77_v41 }
 0x158   :  { %v155_v44 = vpop.f32.mrf.mxu0 }
 0x159   :  { %326 = vmatmul.mubr.msk.f32.vlgmr.msra.gmra.mxu1 %vm163_vm11, %v155_v44 }
 0x15a   :  { %v316_v45 = vpop.f32.mrf.mxu0 }
 0x219   :  { %v233_v47 = vpop.f32.mrf.mxu1 }
 0x21a   :  { %v238_v48 = vsel %vm237_vm12, %v233_v47, -inf  ;;  %v255_v50 = vsel %vm254_vm13, %v233_v47, 0.0 }
 0x21b   :  { %239 = vmax.xlane.f32.xlu0 %v238_v48  ;;  %v327_v49 = vpop.f32.mrf.mxu1  ;;  %v256_v51 = vsel %vm237_vm12, %v255_v50, 0.0 }
 0x21f   :  { %257 = vadd.xlane.f32.xlu0 %v256_v51 }
 0x2a4   :  { %v240_v52 = vpop.xlane.xlu0 %239 }
 0x2a5   :  { %v241_v53 = vsub.f32 %v233_v47, %v240_v52 }
 0x2a7   :  { %v242_v54 = vmul.f32 1.442695, %v241_v53 }
 0x2a8   :  { %v258_v61 = vpop.xlane.xlu0 %257 }
 0x2a9   :  { %349 = vpow2.f32 %v242_v54 }
 0x2b6   :  { %v350_v55 = vpop.eup %349 }
 0x2b7   :  { %v244_v56 = vsel %vm237_vm12, %v350_v55, 0.0 }
 0x2b8   :  { %245 = vadd.xlane.f32.xlu1 %v244_v56 }
 0x341   :  { %v246_v57 = vpop.xlane.xlu1 %245 }
 0x342   :  { %351 = vlog2.f32 %v246_v57 }
 0x34f   :  { %v352_v58 = vpop.eup %351 }
 0x350   :  { %v248_v59 = vmul.f32 0.6931472, %v352_v58 }
 0x352   :  { %v249_v60 = vadd.f32 %v248_v59, %v240_v52 }
 0x354   :  { %v259_v62 = vsub.f32 %v258_v61, %v249_v60 }
 0x356   :  { %v260_v63 = vmul.f32 1.442695, %v259_v62 }
 0x358   :  { %353 = vpow2.f32 %v260_v63 }
 0x365   :  { %v354_v0 = vpop.eup %353 }
 0x366   :  { %v262_v1 = vadd.f32 1e-09, %v354_v0 }
 0x368   :  { %355 = vlog2.f32 %v262_v1 }
 0x375   :  { %v356_v3 = vpop.eup %355 }
 0x376   :  { %v264_v4 = vmul.f32 0.6931472, %v356_v3 }
 0x378   :  { %v265_v5 = vsub.f32 0.0, %v264_v4 }
 0x37a   :  { %v272_v6 = vsel %vm271_vm14, %v265_v5, 0.0 }
 0x37b   :  { %273 = vst [vmem:[#allocation2] sm:$0xff] %v272_v6 }
 0x37c   :  { %368 = shalt.err (!%p365_p4)
}
 0x37d   :  { %283 = dma.vmem_to_hbm [thread:$0]  %s281_s3, 128, %s468_s4, [#allocation3]  }
 0x37e   :  { %377 = dma.done.wait [#allocation3], 128  }
 0x37f   :  { %378 = vsyncadd [#allocation3], 4294967168 }
 0x380   :  { %287 = vsyncpa [#allocation3], 1 }

</bundles_post_ra>
